<compile_context>
chip_gen: v6e
topology: v6e:2x2x1
jax: 0.10.0
libtpu: 0.0.40
codegen_flags: <defaults>
</compile_context>

<pallas_src>
from dataclasses import dataclass
from functools import partial

import jax
import jax.numpy as jnp
from jax.experimental import pallas as pl
from jax.experimental.pallas import tpu as pltpu

_LANE = 128
_NEG_BIG = -1.0e30  # finite "-inf" for softmax masking (avoids inf-inf NaNs)


# ---------------------------------------------------------------------------
# helpers
# ---------------------------------------------------------------------------
def _round_up(x, mult):
    return ((x + mult - 1) // mult) * mult


def _pick_block(total, candidates=(512, 256, 128)):
    for c in candidates:
        if c <= total and total % c == 0:
            return c
    return total


def _supports_bf16_eup():
    """bf16 EUP path exists on v6e / v7x; not on v5e or older (or CPU interp)."""
    try:
        kind = jax.devices()[0].device_kind.lower()
    except Exception:
        return False
    return any(tag in kind for tag in ("v6", "v7", "trillium"))


def _vmem_limit_bytes(live_bytes):
    """Generation-aware VMEM cap: live-set estimate x2 (+slack), with headroom."""
    try:
        cap = getattr(pltpu.get_tpu_info(), "vmem_capacity_bytes", 64 << 20)
    except Exception:
        cap = 64 << 20  # conservative (v7x-sized) fallback
    headroom = 16 << 20
    want = 2 * int(live_bytes) + (4 << 20)
    return int(min(max(want, 32 << 20), max(cap - headroom, 32 << 20)))


# ---------------------------------------------------------------------------
# Kernel 1: streamed sum of squared differences (for the two MSE terms).
# Lane-dense (rows, 128) slabs, SMEM output used as the running accumulator.
# ---------------------------------------------------------------------------
def _sse_kernel(a_ref, b_ref, out_ref):
    @pl.when(pl.program_id(0) == 0)
    def _init():
        out_ref[0] = jnp.float32(0.0)

    d = a_ref[...] - b_ref[...]
    out_ref[0] += jnp.sum(d * d)


def _sum_sq_diff(a, b):
    flat_a = a.astype(jnp.float32).reshape(-1)
    flat_b = b.astype(jnp.float32).reshape(-1)
    rows_needed = -(-flat_a.size // _LANE)
    tr = min(256, _round_up(rows_needed, 8))      # row-block of the slab
    per_block = tr * _LANE
    pad = (-flat_a.size) % per_block
    if pad:  # zero padding cancels in the diff; divisor uses the true count
        flat_a = jnp.pad(flat_a, (0, pad))
        flat_b = jnp.pad(flat_b, (0, pad))
    A = flat_a.reshape(-1, _LANE)
    B = flat_b.reshape(-1, _LANE)
    n_blk = A.shape[0] // tr

    sse = pl.pallas_call(
        _sse_kernel,
        out_shape=jax.ShapeDtypeStruct((1,), jnp.float32),
        grid=(n_blk,),
        in_specs=[pl.BlockSpec((tr, _LANE), lambda i: (i, 0)),
                  pl.BlockSpec((tr, _LANE), lambda i: (i, 0))],
        out_specs=pl.BlockSpec(memory_space=pltpu.MemorySpace.SMEM),
        compiler_params=pltpu.CompilerParams(
            dimension_semantics=("arbitrary",)),
    )(A, B)
    return sse[0]


# ---------------------------------------------------------------------------
# Kernel 2: self Gaussian-kernel sum  sum_ij exp(-||a_i - a_j||^2 * inv_bw)
# tiled over row-blocks of A against the fully resident A.  Per-block partial
# sums are written as lane-dense (8,128) tiles -> row-block axis is parallel.
# ---------------------------------------------------------------------------
def _self_mmd_kernel(n_valid, inv_bw, use_bf16_exp, ab_ref, af_ref, part_ref):
    i = pl.program_id(0)
    tb, dp = ab_ref.shape
    npad = af_ref.shape[0]

    ab = ab_ref[...]
    af = af_ref[...]
    dn = (((1,), (1,)), ((), ()))
    ones_row = jnp.ones((1, dp), jnp.float32)

    ab_col = jnp.sum(ab * ab, axis=1, keepdims=True)                            # (tb,1)
    af_row = jax.lax.dot_general(ones_row, af * af, dn,
                                 preferred_element_type=jnp.float32)            # (1,npad)
    gram = jax.lax.dot_general(ab, af, dn, preferred_element_type=jnp.float32)  # (tb,npad)
    sq = jnp.maximum(ab_col + af_row - 2.0 * gram, 0.0)

    row_ok = (i * tb + jax.lax.broadcasted_iota(jnp.int32, (tb, 1), 0)) < n_valid
    col_ok = jax.lax.broadcasted_iota(jnp.int32, (1, npad), 1) < n_valid
    arg = -sq * inv_bw
    if use_bf16_exp:   # bf16 EUP path (v6e/v7x only); statistics tolerate it
        ex = jnp.exp(arg.astype(jnp.bfloat16)).astype(jnp.float32)
    else:
        ex = jnp.exp(arg)
    part = jnp.sum(jnp.where(jnp.logical_and(row_ok, col_ok), ex, 0.0))

    rsel = jax.lax.broadcasted_iota(jnp.int32, (8, _LANE), 0)
    part_ref[0, :, :] = jnp.where(rsel == 0, part, 0.0)


# ---------------------------------------------------------------------------
# Kernel 3 (main): per row-block of x against resident x and y:
#   * MMD x-x self-term partial (computed first -> temporaries die early)
#   * MMD x-y cross-term partial (shares sq_xy with the alignment)
#   * C = sqrt(sq_xy), P = row-softmax(-C)  (f32 exp, exact divide)
#   * Loss3 partial = sum ||x - P @ y||^2 over valid rows
# ---------------------------------------------------------------------------
def _cross_kernel(n_valid, m_valid, inv_bw, use_bf16_exp,
                  xb_ref, xf_ref, y_ref, p_ref, part_ref):
    i = pl.program_id(0)
    tq, dp = xb_ref.shape
    npad = xf_ref.shape[0]
    mpad = y_ref.shape[0]

    xb = xb_ref[...]
    xf = xf_ref[...]
    y = y_ref[...]

    dn = (((1,), (1,)), ((), ()))
    ones_row = jnp.ones((1, dp), jnp.float32)

    xb_col = jnp.sum(xb * xb, axis=1, keepdims=True)                            # (tq,1)
    row_ok = (i * tq + jax.lax.broadcasted_iota(jnp.int32, (tq, 1), 0)) < n_valid

    # ---- MMD x-x self term (before the softmax block: shorter VMEM lifetime).
    xf_row = jax.lax.dot_general(ones_row, xf * xf, dn,
                                 preferred_element_type=jnp.float32)            # (1,npad)
    gxx = jax.lax.dot_general(xb, xf, dn, preferred_element_type=jnp.float32)   # (tq,npad)
    sq_xx = jnp.maximum(xb_col + xf_row - 2.0 * gxx, 0.0)
    colx_ok = jax.lax.broadcasted_iota(jnp.int32, (1, npad), 1) < n_valid
    arg_xx = -sq_xx * inv_bw
    exx = (jnp.exp(arg_xx.astype(jnp.bfloat16)).astype(jnp.float32)
           if use_bf16_exp else jnp.exp(arg_xx))
    xx_part = jnp.sum(jnp.where(jnp.logical_and(row_ok, colx_ok), exx, 0.0))

    # ---- cross term: squared distances shared by MMD and the alignment.
    y_row = jax.lax.dot_general(ones_row, y * y, dn,
                                preferred_element_type=jnp.float32)             # (1,mpad)
    gxy = jax.lax.dot_general(xb, y, dn, preferred_element_type=jnp.float32)    # (tq,mpad)
    sq_xy = jnp.maximum(xb_col + y_row - 2.0 * gxy, 0.0)                        # f32 (cancellation-sensitive)
    coly_ok = jax.lax.broadcasted_iota(jnp.int32, (1, mpad), 1) < m_valid
    mask_xy = jnp.logical_and(row_ok, coly_ok)
    arg_xy = -sq_xy * inv_bw
    exy = (jnp.exp(arg_xy.astype(jnp.bfloat16)).astype(jnp.float32)
           if use_bf16_exp else jnp.exp(arg_xy))
    xy_part = jnp.sum(jnp.where(mask_xy, exy, 0.0))

    # ---- euclidean_dist + alignment (row softmax of -C); padded cols masked,
    # exact divide so P is exactly row-stochastic (returned + feeds Loss3).
    C = jnp.sqrt(jnp.maximum(sq_xy, 1e-12))
    neg = jnp.where(coly_ok, -C, _NEG_BIG)
    e = jnp.exp(neg - jnp.max(neg, axis=1, keepdims=True))
    P = e / jnp.sum(e, axis=1, keepdims=True)
    p_ref[...] = P.astype(p_ref.dtype)

    # ---- Loss3 partial = sum over valid rows of ||x - P @ y||^2
    recon = jnp.dot(P, y, preferred_element_type=jnp.float32)                   # (tq,dp)
    diff = jnp.where(row_ok, xb - recon, 0.0)
    l3_part = jnp.sum(diff * diff)

    # per-block partial scalars packed into one lane-dense (8,128) tile
    rsel = jax.lax.broadcasted_iota(jnp.int32, (8, _LANE), 0)
    part_ref[0, :, :] = (jnp.where(rsel == 0, xy_part, 0.0)
                         + jnp.where(rsel == 1, xx_part, 0.0)
                         + jnp.where(rsel == 2, l3_part, 0.0))


# ---------------------------------------------------------------------------
# scPIA_Loss forward
# ---------------------------------------------------------------------------
@dataclass
class Param:
    lambda1: float = 1.0
    lambda2: float = 1.0


def scpia_loss(inputs_list, ae_encoded_list, ae_decoded_list, param: Param):
    x = ae_encoded_list[0].astype(jnp.float32)
    y = ae_encoded_list[1].astype(jnp.float32)
    n, d = x.shape
    m = y.shape[0]
    inv_bw = 1.0 / float(d * d)
    use_bf16_exp = _supports_bf16_eup()

    # Loss1: streamed MSE kernels (kept out of the fused pairwise kernel).
    loss1_1 = _sum_sq_diff(inputs_list[0], ae_decoded_list[0]) / float(inputs_list[0].size)
    loss1_2 = _sum_sq_diff(inputs_list[1], ae_decoded_list[1]) / float(inputs_list[1].size)

    # Pad rows and feature dim to multiples of 128 (lane-dense everywhere).
    n_pad = _round_up(n, _LANE)
    m_pad = _round_up(m, _LANE)
    d_pad = _round_up(d, _LANE)
    xp = jnp.pad(x, ((0, n_pad - n), (0, d_pad - d)))
    yp = jnp.pad(y, ((0, m_pad - m), (0, d_pad - d)))

    tq = _pick_block(n_pad)           # x row-block
    tb = _pick_block(m_pad)           # y row-block (self term)
    n_blk = n_pad // tq
    m_blk = m_pad // tb

    # Live-set estimate for the main kernel (resident x/y + block buffers +
    # the (tq, n_pad)/(tq, m_pad) temporaries), doubled inside _vmem_limit_bytes.
    live_main = 4 * (n_pad * d_pad + m_pad * d_pad + 3 * tq * d_pad
                     + 2 * tq * n_pad + 6 * tq * m_pad)
    p_padded, parts = pl.pallas_call(
        partial(_cross_kernel, n, m, inv_bw, use_bf16_exp),
        out_shape=(jax.ShapeDtypeStruct((n_pad, m_pad), jnp.float32),
                   jax.ShapeDtypeStruct((n_blk, 8, _LANE), jnp.float32)),
        grid=(n_blk,),
        in_specs=[pl.BlockSpec((tq, d_pad), lambda i: (i, 0)),       # x row-block
                  pl.BlockSpec((n_pad, d_pad), lambda i: (0, 0)),    # x resident
                  pl.BlockSpec((m_pad, d_pad), lambda i: (0, 0))],   # y resident
        out_specs=(pl.BlockSpec((tq, m_pad), lambda i: (i, 0)),      # P (lane-dense)
                   pl.BlockSpec((1, 8, _LANE), lambda i: (i, 0, 0))),
        compiler_params=pltpu.CompilerParams(
            dimension_semantics=("parallel",),                       # megacore-safe
            vmem_limit_bytes=_vmem_limit_bytes(live_main)),
    )(xp, xp, yp)

    live_yy = 4 * (m_pad * d_pad + 3 * tb * d_pad + 3 * tb * m_pad)
    yy_parts = pl.pallas_call(
        partial(_self_mmd_kernel, m, inv_bw, use_bf16_exp),
        out_shape=jax.ShapeDtypeStruct((m_blk, 8, _LANE), jnp.float32),
        grid=(m_blk,),
        in_specs=[pl.BlockSpec((tb, d_pad), lambda i: (i, 0)),
                  pl.BlockSpec((m_pad, d_pad), lambda i: (0, 0))],
        out_specs=pl.BlockSpec((1, 8, _LANE), lambda i: (i, 0, 0)),
        compiler_params=pltpu.CompilerParams(
            dimension_semantics=("parallel",),
            vmem_limit_bytes=_vmem_limit_bytes(live_yy)),
    )(yp, yp)

    xy_sum = jnp.sum(parts[:, 0, 0])
    xx_sum = jnp.sum(parts[:, 1, 0])
    l3_sum = jnp.sum(parts[:, 2, 0])
    yy_sum = jnp.sum(yy_parts[:, 0, 0])

    loss2 = (xx_sum / float(n * n) + yy_sum / float(m * m)
             - 2.0 * xy_sum / float(n * m))
    loss3 = l3_sum / float(n * d)

    total = loss1_1 + loss1_2 + param.lambda1 * loss2 + param.lambda2 * loss3
    return total, p_padded[:n, :m]


# ---------------------------------------------------------------------------
# pure-JAX reference (mirrors the gen-gated bf16 exp choice for MMD)
# ---------------------------------------------------------------------------
def _reference(inputs_list, enc_list, dec_list, param, use_bf16_exp):
    def mse(a, b):
        return jnp.mean((a - b) ** 2)

    x = enc_list[0].astype(jnp.float32)
    y = enc_list[1].astype(jnp.float32)
    d = x.shape[1]
    inv_bw = 1.0 / float(d * d)

    def sqdist(a, b):
        an = jnp.sum(a * a, axis=1, keepdims=True)
        bn = jnp.sum(b * b, axis=1, keepdims=True)
        return jnp.maximum(an + bn.T - 2.0 * (a @ b.T), 0.0)

    def kmean(s):
        arg = -s * inv_bw
        if use_bf16_exp:
            arg = arg.astype(jnp.bfloat16)
        return jnp.mean(jnp.exp(arg).astype(jnp.float32))

    sxy = sqdist(x, y)
    mmd = kmean(sqdist(x, x)) + kmean(sqdist(y, y)) - 2.0 * kmean(sxy)
    C = jnp.sqrt(jnp.maximum(sxy, 1e-12))
    P = jax.nn.softmax(-C, axis=1)
    l1 = mse(inputs_list[0], dec_list[0]) + mse(inputs_list[1], dec_list[1])
    l3 = mse(x, P @ y)
    return l1 + param.lambda1 * mmd + param.lambda2 * l3, P


if __name__ == "__main__":
    key = jax.random.PRNGKey(0)
    k0, k1, k2, k3, k4, k5 = jax.random.split(key, 6)

    # Two modalities with n = m = 16 cells, latent dim 32, input dims 64 / 48.
    n, m, d_lat, D0, D1 = 16, 16, 32, 64, 48

    inputs0 = jax.random.normal(k0, (n, D0), dtype=jnp.float32)
    inputs1 = jax.random.normal(k1, (m, D1), dtype=jnp.float32)
    decoded0 = inputs0 + 0.1 * jax.random.normal(k2, (n, D0), dtype=jnp.float32)
    decoded1 = inputs1 + 0.1 * jax.random.normal(k3, (m, D1), dtype=jnp.float32)
    encoded0 = jax.random.normal(k4, (n, d_lat), dtype=jnp.float32)
    encoded1 = jax.random.normal(k5, (m, d_lat), dtype=jnp.float32)

    param = Param(lambda1=1.0, lambda2=1.0)

    total_loss, p_pred = scpia_loss(
        [inputs0, inputs1], [encoded0, encoded1], [decoded0, decoded1], param)
    total_loss = jax.block_until_ready(total_loss)
    p_pred = jax.block_until_ready(p_pred)

    assert p_pred.shape == (n, m)
    assert bool(jnp.isfinite(total_loss))
    # Alignment is an exact row softmax -> rows sum to 1.
    assert bool(jnp.allclose(jnp.sum(p_pred, axis=1), 1.0, atol=1e-3))

    ref_total, ref_P = _reference(
        [inputs0, inputs1], [encoded0, encoded1], [decoded0, decoded1],
        param, _supports_bf16_eup())
    assert bool(jnp.allclose(p_pred, ref_P, atol=2e-3))
    assert bool(jnp.allclose(total_loss, ref_total, rtol=1e-2, atol=1e-3))

    print("KERNEL_OK")
</pallas_src>

<mosaic_0001>
module attributes {stable_mosaic.version = 11 : i64} {
  func.func @_sse_kernel(%arg0: i32, %arg1: memref<8x128xf32, #tpu.memory_space<vmem>>, %arg2: memref<8x128xf32, #tpu.memory_space<vmem>>, %arg3: memref<1xf32, #tpu.memory_space<smem>>) attributes {dimension_semantics = [#tpu.dimension_semantics<arbitrary>], iteration_bounds = array<i64: 1>, scalar_prefetch = 0 : i64, scratch_operands = 0 : i64, tpu.core_type = #tpu.core_type<tc>, window_params = [{transform_indices = @transform_0, window_bounds = array<i64: 8, 128>}, {transform_indices = @transform_1, window_bounds = array<i64: 8, 128>}, {transform_indices = @transform_2, window_bounds = array<i64: 1>}]} {
    %c0_i32 = arith.constant 0 : i32
    %0 = arith.cmpi eq, %arg0, %c0_i32 : i32
    %1 = arith.extui %0 : i1 to i32
    %c0_i32_0 = arith.constant 0 : i32
    %2 = arith.cmpi ne, %1, %c0_i32_0 : i32
    scf.if %2 {
      %cst_6 = arith.constant 0.000000e+00 : f32
      %c0_7 = arith.constant 0 : index
      %14 = memref.load %arg3[%c0_7] : memref<1xf32, #tpu.memory_space<smem>>
      memref.store %cst_6, %arg3[%c0_7] : memref<1xf32, #tpu.memory_space<smem>>
    } else {
    }
    %c0 = arith.constant 0 : index
    %c0_1 = arith.constant 0 : index
    %3 = vector.load %arg1[%c0, %c0_1] : memref<8x128xf32, #tpu.memory_space<vmem>>, vector<8x128xf32>
    %c0_2 = arith.constant 0 : index
    %c0_3 = arith.constant 0 : index
    %4 = vector.load %arg2[%c0_2, %c0_3] : memref<8x128xf32, #tpu.memory_space<vmem>>, vector<8x128xf32>
    %5 = arith.subf %3, %4 : vector<8x128xf32>
    %c0_4 = arith.constant 0 : index
    %6 = memref.load %arg3[%c0_4] : memref<1xf32, #tpu.memory_space<smem>>
    %7 = arith.mulf %5, %5 : vector<8x128xf32>
    %8 = vector.shape_cast %7 : vector<8x128xf32> to vector<1x8x128xf32>
    %cst = arith.constant dense<0.000000e+00> : vector<1xf32>
    %9 = vector.multi_reduction <add>, %8, %cst [1, 2] : vector<1x8x128xf32> to vector<1xf32>
    %10 = vector.shape_cast %9 : vector<1xf32> to vector<1x1x1xf32>
    %11 = vector.extract %10[0, 0, 0] : f32 from vector<1x1x1xf32>
    %12 = arith.addf %6, %11 : f32
    %c0_5 = arith.constant 0 : index
    %13 = memref.load %arg3[%c0_5] : memref<1xf32, #tpu.memory_space<smem>>
    memref.store %12, %arg3[%c0_5] : memref<1xf32, #tpu.memory_space<smem>>
    return
  }
  func.func @transform_0(%arg0: i32) -> (i32, i32) {
    %c0_i32 = arith.constant 0 : i32
    %c0_i32_0 = arith.constant 0 : i32
    return %arg0, %c0_i32 : i32, i32
  }
  func.func @transform_1(%arg0: i32) -> (i32, i32) {
    %c0_i32 = arith.constant 0 : i32
    %c0_i32_0 = arith.constant 0 : i32
    return %arg0, %c0_i32 : i32, i32
  }
  func.func @transform_2(%arg0: i32) -> i32 {
    %c0_i32 = arith.constant 0 : i32
    %c0_i32_0 = arith.constant 0 : i32
    return %c0_i32 : i32
  }
}

</mosaic_0001>

<bundles_post_ra>
// kernel: tpu_custom_call.1
= control target key start
LH: loop header
LB: loop body
LE: loop exit
PB: predicated region body
PF: predicated region fallthrough
CT: control target
= control target key end

     0   :  { %7 = vsyncpa [#allocation3], 0  ;;  %s161_s0 = inlined_call_operand.hbm [shape: f32[8,128], index: 0, kind: input, shape index: {}]   ;;  %s162_s1 = inlined_call_operand.hbm [shape: f32[8,128], index: 1, kind: input, shape index: {}]   ;;  %s163_s2 = inlined_call_operand.hbm [shape: f32[1], index: 2, kind: output, shape index: {}]  }
   0x1   :  { %8 = vsyncpa [#allocation6], 0 }
   0x2   :  { %9 = vsyncpa [#allocation4], 0  ;;  %s134_s9 = smov [#allocation2]   ;;  %s135_s11 = smov [#allocation5]  }
   0x3   :  { %s16_s10 = sshll.u32 %s134_s9, 4  ;;  %s26_s12 = sshll.u32 %s135_s11, 4  ;;  %s17_s10 = int_to_ptr.vmem [resolvable:$true] %s16_s10  ;;  %s27_s12 = int_to_ptr.vmem [resolvable:$true] %s26_s12 }
   0x4   :  { %s88_s13 = scalar_lea.vmem %s17_s10, 128  ;;  %p93_p1 = scmp.lt.s32.totalorder %s17_s10, %s17_s10 }
   0x5   :  { %p89_p0 = scmp.ne.s32.totalorder %s17_s10, %s88_s13  ;;  %p94_p2 = scmp.lt.s32.totalorder %s88_s13, %s88_s13 }
   0x7   :  { %p95_p3 = por %p94_p2, %p93_p1 }
   0x9   :  { %p96_p4 = pnand %p95_p3, %p89_p0 }
   0xb   :  { %99 = shalt.err (!%p96_p4)
}
   0xc   :  { %19 = dma.hbm_to_vmem [thread:$0]  %s161_s0, 128, %s17_s10, [#allocation3]  }
   0xd   :  { %s108_s16 = scalar_lea.vmem %s27_s12, 128  ;;  %p113_p6 = scmp.lt.s32.totalorder %s27_s12, %s27_s12 }
   0xe   :  { %p109_p5 = scmp.ne.s32.totalorder %s27_s12, %s108_s16  ;;  %p114_p7 = scmp.lt.s32.totalorder %s108_s16, %s108_s16 }
  0x10   :  { %p115_p8 = por %p114_p7, %p113_p6 }
  0x12   :  { %p116_p9 = pnand %p115_p8, %p109_p5 }
  0x14   :  { %119 = shalt.err (!%p116_p9)
}
  0x15   :  { %29 = dma.hbm_to_vmem [thread:$0]  %s162_s1, 128, %s27_s12, [#allocation6]  }
  0x16   :  { %128 = dma.done.wait [#allocation3], 128  }
  0x17   :  { %129 = vsyncadd [#allocation3], 4294967168 }
  0x18   :  { %130 = dma.done.wait [#allocation6], 128  }
  0x19   :  { %131 = vsyncadd [#allocation6], 4294967168  ;;  %v42_v0 = vld [vmem:[#allocation2] sm:$0xff]  ;;  %v43_v1 = vld [vmem:[#allocation5] sm:$0xff]  ;;  %s136_s1 = smov [#allocation7]  }
  0x1a   :  { %v44_v2 = vsub.f32 %v42_v0, %v43_v1 }
  0x1c   :  { %v46_v3 = vmul.f32 %v44_v2, %v44_v2 }
  0x1e   :  { %47 = vadd.xlane.f32.xlu0 %v46_v3 }
  0xa7   :  { %v48_v4 = vpop.xlane.xlu0 %47 }
  0xa8   :  { %v49_v5 = vrot.slane %v48_v4, 4 }
  0xaa   :  { %v50_v6 = vadd.f32 %v49_v5, %v48_v4 }
  0xac   :  { %v51_v7 = vrot.slane %v50_v6, 2 }
  0xae   :  { %v52_v8 = vadd.f32 %v51_v7, %v50_v6 }
  0xb0   :  { %v53_v9 = vrot.slane %v52_v8, 1 }
  0xb2   :  { %v54_v10 = vadd.f32 %v53_v9, %v52_v8 }
  0xb4   :  { %74 = vpush %v54_v10 }
  0xe5   :  { %s75_s0 = spop %74 }
  0xe6   :  { %58 = sst [smem:[#allocation7]] %s75_s0 }
  0xe7   :  { %66 = dma.smem_to_hbm %s136_s1, 16, %s163_s2, [#allocation4]  }
  0xe8   :  { %132 = dma.done.wait [#allocation4], 16  }
  0xe9   :  { %133 = vsyncadd [#allocation4], 4294967280 }
  0xea   :  { %70 = sfence }
  0xeb   :  { %71 = vsyncpa [#allocation3], 1 }
  0xec   :  { %72 = vsyncpa [#allocation6], 1 }
  0xed   :  { %73 = vsyncpa [#allocation4], 1 }

</bundles_post_ra>
